<compile_context>
chip_gen: v7x
topology: tpu7x:2x2x1
jax: 0.10.0
libtpu: 0.0.40
codegen_flags: <defaults>
</compile_context>

<pallas_src>
import math

import jax
import jax.numpy as jnp
from jax.experimental import pallas as pl
from jax.experimental.pallas import tpu as pltpu


def _round_up(x: int, m: int) -> int:
    return ((x + m - 1) // m) * m


def _pick_batch_tiling(B: int, max_tile_b: int = 512):
    """Pick (tile_b, b_pad) so tile_b | b_pad, tile_b % 16 == 0, and the batch
    grid has >= 2 steps whenever there are enough rows (v7x megacore)."""
    b_pad = _round_up(B, 16)
    tile_b = min(max_tile_b, b_pad)
    if b_pad >= 32 and b_pad // tile_b < 2:
        tile_b = _round_up(pl.cdiv(b_pad, 2), 16)
    b_pad = _round_up(b_pad, tile_b)
    return tile_b, b_pad


def _resident_spec(block_shape):
    """BlockSpec for an operand that is identical across all grid steps.
    Requests a single pipeline buffer when the JAX version supports it."""
    zero_map = lambda i: (0,) * len(block_shape)
    buffered = getattr(pl, "Buffered", None)
    if buffered is not None:
        try:
            return pl.BlockSpec(block_shape, zero_map, pipeline_mode=buffered(1))
        except TypeError:
            pass
    return pl.BlockSpec(block_shape, zero_map)


def _encoder_fc_kernel(x_ref, w_ref, b_ref, o_ref):
    # x_ref: (TILE_B, K) f32   w_ref: (K, N) bf16   b_ref: (1, N) f32
    # o_ref: (TILE_B, N) out_dtype
    x = x_ref[...].astype(w_ref.dtype)          # in-vreg cast, hidden under MXU/DMA
    acc = jnp.dot(x, w_ref[...], preferred_element_type=jnp.float32)
    acc = acc + b_ref[...]                      # broadcast (1, N) over rows
    o_ref[...] = jnp.maximum(acc, 0.0).astype(o_ref.dtype)


def prepare_encoder_fc_params(w, b, *, weight_dtype=jnp.bfloat16):
    """Do once at init (hoists the per-call weight cast out of the hot path).

    w: (784, N)  -- W^T of nn.Linear.weight;  b: (N,).
    Returns (w_bf16, bias_2d_f32) ready for encoder_fc_small()."""
    w_c = jnp.asarray(w, dtype=weight_dtype)
    b2 = jnp.asarray(b, dtype=jnp.float32).reshape(1, -1)
    return w_c, b2


def encoder_fc_small(x_nchw, w_c, b2, *, max_tile_b=512, out_dtype=jnp.float32):
    """relu(flatten(x) @ W + b).

    x_nchw: (B, C, H, W) with C*H*W == w_c.shape[0] (f32),
    w_c: (784, N) bf16 (prepared once), b2: (1, N) f32 (prepared once).
    Returns (B, N) in out_dtype (f32 default; pass bf16 to halve writeback)."""
    B = x_nchw.shape[0]
    K = math.prod(x_nchw.shape[1:])
    N = w_c.shape[1]
    assert K == w_c.shape[0]
    assert b2.shape == (1, N)

    # nn.Flatten(start_dim=1) -- row-major reshape, pure layout glue.
    x = x_nchw.reshape(B, K)

    tile_b, b_pad = _pick_batch_tiling(B, max_tile_b)
    if b_pad != B:
        # Only materializes an extra activation copy when B isn't a tile multiple.
        x = jnp.pad(x, ((0, b_pad - B), (0, 0)))

    out = pl.pallas_call(
        _encoder_fc_kernel,
        out_shape=jax.ShapeDtypeStruct((b_pad, N), out_dtype),
        grid_spec=pltpu.PrefetchScalarGridSpec(
            num_scalar_prefetch=0,
            grid=(b_pad // tile_b,),
            in_specs=[
                pl.BlockSpec((tile_b, K), lambda i: (i, 0)),   # x: tiled over batch
                _resident_spec((K, N)),                        # W: resident in VMEM
                _resident_spec((1, N)),                        # bias: resident
            ],
            out_specs=pl.BlockSpec((tile_b, N), lambda i: (i, 0)),
        ),
        compiler_params=pltpu.CompilerParams(
            dimension_semantics=("parallel",),     # batch rows independent -> megacore
        ),
    )(x, w_c, b2)
    return out[:B]


if __name__ == "__main__":
    latent_dim = 512
    in_features = 784          # 1 * 28 * 28, as required by nn.Linear(784, .)
    B = 2

    key = jax.random.PRNGKey(0)
    k_x, k_w, k_b = jax.random.split(key, 3)

    # Deterministic "PyTorch-style" init: U(-1/sqrt(fan_in), 1/sqrt(fan_in)).
    bound = 1.0 / (in_features ** 0.5)
    # weight stored as (in_features, latent_dim) == W^T of nn.Linear.weight
    w = jax.random.uniform(k_w, (in_features, latent_dim),
                           minval=-bound, maxval=bound, dtype=jnp.float32)
    b = jax.random.uniform(k_b, (latent_dim,),
                           minval=-bound, maxval=bound, dtype=jnp.float32)

    # NCHW input, as the PyTorch module would receive (e.g. MNIST-like).
    x = jax.random.normal(k_x, (B, 1, 28, 28), dtype=jnp.float32)

    # Hoisted, one-time parameter preparation (not in the per-call hot path).
    w_c, b2 = prepare_encoder_fc_params(w, b)

    out = encoder_fc_small(x, w_c, b2)
    out = jax.block_until_ready(out)

    # Cross-check against plain-JAX f32 reference (loose tol for bf16 weights).
    ref = jnp.maximum(x.reshape(B, -1) @ w + b, 0.0)
    assert out.shape == (B, latent_dim)
    assert out.dtype == jnp.float32
    assert jnp.allclose(out, ref, atol=3e-2, rtol=3e-2)

    print("KERNEL_OK")
</pallas_src>

<mosaic_0001>
module attributes {stable_mosaic.version = 11 : i64} {
  func.func @_encoder_fc_kernel(%arg0: i32, %arg1: memref<16x784xf32, #tpu.memory_space<vmem>>, %arg2: memref<784x512xbf16, #tpu.memory_space<vmem>>, %arg3: memref<1x512xf32, #tpu.memory_space<vmem>>, %arg4: memref<16x512xf32, #tpu.memory_space<vmem>>) attributes {dimension_semantics = [#tpu.dimension_semantics<parallel>], iteration_bounds = array<i64: 1>, scalar_prefetch = 0 : i64, scratch_operands = 0 : i64, tpu.core_type = #tpu.core_type<tc>, window_params = [{transform_indices = @transform_0, window_bounds = array<i64: 16, 784>}, {pipeline_mode = #tpu.pipeline_mode<synchronous>, transform_indices = @transform_1, window_bounds = array<i64: 784, 512>}, {pipeline_mode = #tpu.pipeline_mode<synchronous>, transform_indices = @transform_2, window_bounds = array<i64: 1, 512>}, {transform_indices = @transform_3, window_bounds = array<i64: 16, 512>}]} {
    %c0 = arith.constant 0 : index
    %c0_0 = arith.constant 0 : index
    %0 = vector.load %arg1[%c0, %c0_0] : memref<16x784xf32, #tpu.memory_space<vmem>>, vector<16x784xf32>
    %1 = arith.truncf %0 : vector<16x784xf32> to vector<16x784xbf16>
    %c0_1 = arith.constant 0 : index
    %c0_2 = arith.constant 0 : index
    %2 = vector.load %arg2[%c0_1, %c0_2] : memref<784x512xbf16, #tpu.memory_space<vmem>>, vector<784x512xbf16>
    %cst = arith.constant dense<0.000000e+00> : vector<16x512xf32>
    %3 = tpu.matmul %1, %2, %cst {dimension_numbers = #tpu.dot_dimension_numbers<[1], [0], [0], [1], [0, 0, 1, 1], [], []>} : vector<16x784xbf16>, vector<784x512xbf16>, vector<16x512xf32> -> vector<16x512xf32>
    %c0_3 = arith.constant 0 : index
    %c0_4 = arith.constant 0 : index
    %4 = vector.load %arg3[%c0_3, %c0_4] : memref<1x512xf32, #tpu.memory_space<vmem>>, vector<1x512xf32>
    %5 = vector.broadcast %4 : vector<1x512xf32> to vector<16x512xf32>
    %6 = arith.addf %3, %5 : vector<16x512xf32>
    %cst_5 = arith.constant 0.000000e+00 : f32
    %7 = vector.broadcast %cst_5 : f32 to vector<16x512xf32>
    %8 = arith.maximumf %6, %7 : vector<16x512xf32>
    %c0_6 = arith.constant 0 : index
    %c0_7 = arith.constant 0 : index
    %9 = vector.load %arg4[%c0_6, %c0_7] : memref<16x512xf32, #tpu.memory_space<vmem>>, vector<16x512xf32>
    tpu.vector_store %arg4[%c0_6, %c0_7], %8 {strides = array<i32>} : memref<16x512xf32, #tpu.memory_space<vmem>>, vector<16x512xf32>,
    return
  }
  func.func @transform_0(%arg0: i32) -> (i32, i32) {
    %c0_i32 = arith.constant 0 : i32
    %c0_i32_0 = arith.constant 0 : i32
    return %arg0, %c0_i32 : i32, i32
  }
  func.func @transform_1(%arg0: i32) -> (i32, i32) {
    %c0_i32 = arith.constant 0 : i32
    %c0_i32_0 = arith.constant 0 : i32
    %c0_i32_1 = arith.constant 0 : i32
    return %c0_i32, %c0_i32_0 : i32, i32
  }
  func.func @transform_2(%arg0: i32) -> (i32, i32) {
    %c0_i32 = arith.constant 0 : i32
    %c0_i32_0 = arith.constant 0 : i32
    %c0_i32_1 = arith.constant 0 : i32
    return %c0_i32, %c0_i32_0 : i32, i32
  }
  func.func @transform_3(%arg0: i32) -> (i32, i32) {
    %c0_i32 = arith.constant 0 : i32
    %c0_i32_0 = arith.constant 0 : i32
    return %arg0, %c0_i32 : i32, i32
  }
}

</mosaic_0001>

<bundles_post_ra>
// kernel: tpu_custom_call.1
= control target key start
LH: loop header
LB: loop body
LE: loop exit
PB: predicated region body
PF: predicated region fallthrough
CT: control target
= control target key end

     0   :  { %8 = vsyncpa [#allocation3], 0  ;;  %s2320_s0 = inlined_call_operand.hbm [shape: f32[16,784], index: 0, kind: input, shape index: {}]   ;;  %s2321_s1 = inlined_call_operand.hbm [shape: bf16[784,512], index: 1, kind: input, shape index: {}]   ;;  %s2322_s2 = inlined_call_operand.vmem [shape: f32[1,512], index: 2, kind: input, shape index: {}]   ;;  %s2323_s3 = inlined_call_operand.hbm [shape: f32[16,512], index: 3, kind: output, shape index: {}]  }
   0x1   :  { %9 = vsyncpa [#allocation6], 0 }
   0x2   :  { %10 = vsyncpa [#allocation4], 0  ;;  %s2251_s12 = smov [#allocation2]   ;;  %s2179_s16 = scalar_lea.hbm %s2320_s0, 1792 }
   0x3   :  { %s16_s13 = sshll.u32 %s2251_s12, 4  ;;  %p2180_p0 = scmp.ne.s32.totalorder %s2320_s0, %s2179_s16  ;;  %s17_s13 = int_to_ptr.vmem [resolvable:$true] %s16_s13 }
   0x4   :  { %p2183_p1 = scmp.lt.u32.totalorder %s2179_s16, %s2320_s0 }
   0x6   :  { %p2185_p2 = pnand %p2183_p1, %p2180_p0 }
   0x8   :  { %2188 = shalt.err (!%p2185_p2)
}
   0x9   :  { %s2189_s21 = scalar_lea.vmem %s17_s13, 1792  ;;  %p2194_p4 = scmp.lt.s32.totalorder %s17_s13, %s17_s13 }
   0xa   :  { %p2190_p3 = scmp.ne.s32.totalorder %s17_s13, %s2189_s21  ;;  %p2195_p5 = scmp.lt.s32.totalorder %s2189_s21, %s2189_s21 }
   0xc   :  { %p2196_p6 = por %p2195_p5, %p2194_p4 }
   0xe   :  { %p2197_p7 = pnand %p2196_p6, %p2190_p3 }
  0x10   :  { %2200 = shalt.err (!%p2197_p7)
}
  0x11   :  { %s2252_s22 = smov 896   ;;  %s2253_s23 = smov 56  }
  0x12   :  { %22 = dma.hbm_to_vmem [thread:$0]  %s2320_s0, 1792, %s17_s13, [#allocation3], %s2252_s22, %s2252_s22, %s2253_s23  }
  0x13   :  { %s2254_s26 = smov [#allocation5]   ;;  %s2201_s30 = scalar_lea.hbm %s2321_s1, 25088 }
  0x14   :  { %s28_s27 = sshll.u32 %s2254_s26, 4  ;;  %p2202_p8 = scmp.ne.s32.totalorder %s2321_s1, %s2201_s30  ;;  %s29_s27 = int_to_ptr.vmem [resolvable:$true] %s28_s27 }
  0x15   :  { %p2205_p9 = scmp.lt.u32.totalorder %s2201_s30, %s2321_s1 }
  0x17   :  { %p2207_p10 = pnand %p2205_p9, %p2202_p8 }
  0x19   :  { %2210 = shalt.err (!%p2207_p10)
}
  0x1a   :  { %s2211_s8 = scalar_lea.vmem %s29_s27, 25088  ;;  %p2216_p12 = scmp.lt.s32.totalorder %s29_s27, %s29_s27 }
  0x1b   :  { %p2212_p11 = scmp.ne.s32.totalorder %s29_s27, %s2211_s8  ;;  %p2217_p13 = scmp.lt.s32.totalorder %s2211_s8, %s2211_s8 }
  0x1d   :  { %p2218_p0 = por %p2217_p13, %p2216_p12 }
  0x1f   :  { %p2219_p1 = pnand %p2218_p0, %p2212_p11 }
  0x21   :  { %2222 = shalt.err (!%p2219_p1)
}
  0x22   :  { %s2255_s0 = smov 256   ;;  %s2256_s9 = smov 16  }
  0x23   :  { %34 = dma.hbm_to_vmem [thread:$0]  %s2321_s1, 25088, %s29_s27, [#allocation6], %s2255_s0, %s2255_s0, %s2256_s9  }
  0x24   :  { %2245 = dma.done.wait [#allocation3], 1792  }
  0x25   :  { %2246 = vsyncadd [#allocation3], 4294965504 }
  0x26   :  { %2247 = dma.done.wait [#allocation6], 25088  }
  0x27   :  { %2248 = vsyncadd [#allocation6], 4294942208  ;;  %v1885_v0 = vld [vmem:[#allocation5 + $0x4] ss:$16 sps:$4 sm:$0xff]   ;;  %v1887_v1 = vld [vmem:[#allocation5 + $0xc] ss:$16 sps:$4 sm:$0xff]  }
  0x28   :  { %1267 = vmatprep.subr.bf16.mxu0 %v1885_v0  ;;  %v1889_v2 = vld [vmem:[#allocation5] ss:$16 sps:$4 sm:$0xff]   ;;  %v1890_v3 = vld [vmem:[#allocation5 + $0x8] ss:$16 sps:$4 sm:$0xff]   ;;  %1439 = vmatprep.subr.bf16.mxu1 %v1887_v1  ;;  %v1891_v4 = vld [vmem:[#allocation5 + $0x24] ss:$16 sps:$4 sm:$0xff]  }
  0x29   :  { %1268 = vmatpush1.bf16.msra.mxu0 %v1889_v2  ;;  %1440 = vmatpush1.bf16.msra.mxu1 %v1890_v3  ;;  %v1893_v5 = vld [vmem:[#allocation5 + $0x2c] ss:$16 sps:$4 sm:$0xff]   ;;  %v1895_v6 = vld [vmem:[#allocation5 + $0x20] ss:$16 sps:$4 sm:$0xff]   ;;  %v1896_v7 = vld [vmem:[#allocation5 + $0x28] ss:$16 sps:$4 sm:$0xff]  }
  0x2a   :  { %1269 = vmatprep.subr.bf16.mxu0 %v1891_v4  ;;  %1441 = vmatprep.subr.bf16.mxu1 %v1893_v5  ;;  %v1897_v8 = vld [vmem:[#allocation5 + $0x44] ss:$16 sps:$4 sm:$0xff]   ;;  %v1899_v9 = vld [vmem:[#allocation5 + $0x4c] ss:$16 sps:$4 sm:$0xff]   ;;  %v1901_v10 = vld [vmem:[#allocation5 + $0x40] ss:$16 sps:$4 sm:$0xff]  }
  0x2b   :  { %v1902_v11 = vld [vmem:[#allocation5 + $0x48] ss:$16 sps:$4 sm:$0xff]   ;;  %v1903_v12 = vld [vmem:[#allocation5 + $0x64] ss:$16 sps:$4 sm:$0xff]   ;;  %v1905_v13 = vld [vmem:[#allocation5 + $0x6c] ss:$16 sps:$4 sm:$0xff]  }
  0x2c   :  { %v1907_v14 = vld [vmem:[#allocation5 + $0x60] ss:$16 sps:$4 sm:$0xff]   ;;  %v1908_v15 = vld [vmem:[#allocation5 + $0x68] ss:$16 sps:$4 sm:$0xff]   ;;  %v1909_v16 = vld [vmem:[#allocation5 + $0x84] ss:$16 sps:$4 sm:$0xff]  }
  0x2d   :  { %1270 = vmatpush1.bf16.msra.mxu0 %v1895_v6  ;;  %1442 = vmatpush1.bf16.msra.mxu1 %v1896_v7  ;;  %v1911_v17 = vld [vmem:[#allocation5 + $0x8c] ss:$16 sps:$4 sm:$0xff]   ;;  %v1913_v18 = vld [vmem:[#allocation5 + $0x80] ss:$16 sps:$4 sm:$0xff]   ;;  %v1914_v19 = vld [vmem:[#allocation5 + $0x88] ss:$16 sps:$4 sm:$0xff]  }
  0x2e   :  { %1271 = vmatprep.subr.bf16.mxu0 %v1897_v8  ;;  %1443 = vmatprep.subr.bf16.mxu1 %v1899_v9  ;;  %v1915_v20 = vld [vmem:[#allocation5 + $0xa4] ss:$16 sps:$4 sm:$0xff]   ;;  %v1917_v21 = vld [vmem:[#allocation5 + $0xac] ss:$16 sps:$4 sm:$0xff]   ;;  %v1919_v22 = vld [vmem:[#allocation5 + $0xa0] ss:$16 sps:$4 sm:$0xff]  }
  0x2f   :  { %v1920_v23 = vld [vmem:[#allocation5 + $0xa8] ss:$16 sps:$4 sm:$0xff]   ;;  %v1921_v24 = vld [vmem:[#allocation5 + $0xc4] ss:$16 sps:$4 sm:$0xff]   ;;  %v1923_v25 = vld [vmem:[#allocation5 + $0xcc] ss:$16 sps:$4 sm:$0xff]  }
  0x30   :  { %v1925_v26 = vld [vmem:[#allocation5 + $0xc0] ss:$16 sps:$4 sm:$0xff]   ;;  %v1926_v27 = vld [vmem:[#allocation5 + $0xc8] ss:$16 sps:$4 sm:$0xff]   ;;  %v1927_v28 = vld [vmem:[#allocation5 + $0xe4] ss:$16 sps:$4 sm:$0xff]  }
  0x31   :  { %1272 = vmatpush1.bf16.msra.mxu0 %v1901_v10  ;;  %1444 = vmatpush1.bf16.msra.mxu1 %v1902_v11  ;;  %v1929_v29 = vld [vmem:[#allocation5 + $0xec] ss:$16 sps:$4 sm:$0xff]   ;;  %v1931_v30 = vld [vmem:[#allocation5 + $0xe0] ss:$16 sps:$4 sm:$0xff]   ;;  %v1932_v31 = vld [vmem:[#allocation5 + $0xe8] ss:$16 sps:$4 sm:$0xff]  }
  0x32   :  { %1273 = vmatprep.subr.bf16.mxu0 %v1903_v12  ;;  %1445 = vmatprep.subr.bf16.mxu1 %v1905_v13  ;;  %v1933_v32 = vld [vmem:[#allocation5 + $0x104] ss:$16 sps:$4 sm:$0xff]   ;;  %v1935_v33 = vld [vmem:[#allocation5 + $0x10c] ss:$16 sps:$4 sm:$0xff]   ;;  %v1937_v34 = vld [vmem:[#allocation5 + $0x100] ss:$16 sps:$4 sm:$0xff]  }
  0x33   :  { %v1938_v35 = vld [vmem:[#allocation5 + $0x108] ss:$16 sps:$4 sm:$0xff]   ;;  %v1939_v36 = vld [vmem:[#allocation5 + $0x124] ss:$16 sps:$4 sm:$0xff]   ;;  %v1941_v37 = vld [vmem:[#allocation5 + $0x12c] ss:$16 sps:$4 sm:$0xff]  }
  0x34   :  { %v1943_v38 = vld [vmem:[#allocation5 + $0x120] ss:$16 sps:$4 sm:$0xff]   ;;  %v1944_v39 = vld [vmem:[#allocation5 + $0x128] ss:$16 sps:$4 sm:$0xff]   ;;  %v1945_v40 = vld [vmem:[#allocation5 + $0x144] ss:$16 sps:$4 sm:$0xff]  }
  0x35   :  { %1274 = vmatpush1.bf16.msra.mxu0 %v1907_v14  ;;  %1446 = vmatpush1.bf16.msra.mxu1 %v1908_v15  ;;  %v1947_v41 = vld [vmem:[#allocation5 + $0x14c] ss:$16 sps:$4 sm:$0xff]   ;;  %v1949_v42 = vld [vmem:[#allocation5 + $0x140] ss:$16 sps:$4 sm:$0xff]   ;;  %v1950_v43 = vld [vmem:[#allocation5 + $0x148] ss:$16 sps:$4 sm:$0xff]  }
  0x36   :  { %1275 = vmatprep.subr.bf16.mxu0 %v1909_v16  ;;  %1447 = vmatprep.subr.bf16.mxu1 %v1911_v17  ;;  %v1951_v44 = vld [vmem:[#allocation5 + $0x164] ss:$16 sps:$4 sm:$0xff]   ;;  %v1953_v45 = vld [vmem:[#allocation5 + $0x16c] ss:$16 sps:$4 sm:$0xff]   ;;  %v1955_v48 = vld [vmem:[#allocation5 + $0x160] ss:$16 sps:$4 sm:$0xff]  }
  0x37   :  { %v45_v46 = vld [vmem:[#allocation2 + $0x8] sm:$0xff]  ;;  %v52_v47 = vld [vmem:[#allocation2 + $0x40] sm:$0xff]  ;;  %v51_v5 = vld [vmem:[#allocation2 + $0x38] sm:$0xff]  ;;  %vm1263_vm0 = vcmask 130048   ;;  %s2258_s13 = smov [#allocation7]  }
  0x38   :  { %v1956_v49 = vld [vmem:[#allocation5 + $0x168] ss:$16 sps:$4 sm:$0xff]   ;;  %v59_v50 = vpack.c.bf16 %v52_v47, %v45_v46  ;;  %v1957_v51 = vld [vmem:[#allocation5 + $0x184] ss:$16 sps:$4 sm:$0xff]   ;;  %v1959_v52 = vld [vmem:[#allocation5 + $0x18c] ss:$16 sps:$4 sm:$0xff]  }
  0x39   :  { %1276 = vmatpush1.bf16.msra.mxu0 %v1913_v18  ;;  %1448 = vmatpush1.bf16.msra.mxu1 %v1914_v19  ;;  %v1961_v53 = vld [vmem:[#allocation5 + $0x180] ss:$16 sps:$4 sm:$0xff]   ;;  %v1962_v54 = vld [vmem:[#allocation5 + $0x188] ss:$16 sps:$4 sm:$0xff]   ;;  %v1963_v55 = vld [vmem:[#allocation5 + $0x1a4] ss:$16 sps:$4 sm:$0xff]  }
  0x3a   :  { %1277 = vmatprep.subr.bf16.mxu0 %v1915_v20  ;;  %1449 = vmatprep.subr.bf16.mxu1 %v1917_v21  ;;  %v1965_v56 = vld [vmem:[#allocation5 + $0x1ac] ss:$16 sps:$4 sm:$0xff]   ;;  %v1967_v57 = vld [vmem:[#allocation5 + $0x1a0] ss:$16 sps:$4 sm:$0xff]   ;;  %v1968_v58 = vld [vmem:[#allocation5 + $0x1a8] ss:$16 sps:$4 sm:$0xff]  }
  0x3b   :  { %1299 = vmatprep.mubr.bf16.mxu0 %v59_v50  ;;  %1471 = vmatprep.mubr.bf16.mxu1 %v59_v50  ;;  %v1969_v59 = vld [vmem:[#allocation5 + $0x1c4] ss:$16 sps:$4 sm:$0xff]   ;;  %v1971_v60 = vld [vmem:[#allocation5 + $0x1cc] ss:$16 sps:$4 sm:$0xff]   ;;  %v1973_v61 = vld [vmem:[#allocation5 + $0x1c0] ss:$16 sps:$4 sm:$0xff]  }
  0x3c   :  { %v1974_v62 = vld [vmem:[#allocation5 + $0x1c8] ss:$16 sps:$4 sm:$0xff]   ;;  %v1975_v63 = vld [vmem:[#allocation5 + $0x1e4] ss:$16 sps:$4 sm:$0xff]   ;;  %v1977_v0 = vld [vmem:[#allocation5 + $0x1ec] ss:$16 sps:$4 sm:$0xff]  }
  0x3d   :  { %1278 = vmatpush1.bf16.msra.mxu0 %v1919_v22  ;;  %1450 = vmatpush1.bf16.msra.mxu1 %v1920_v23  ;;  %v1979_v1 = vld [vmem:[#allocation5 + $0x1e0] ss:$16 sps:$4 sm:$0xff]   ;;  %v1980_v2 = vld [vmem:[#allocation5 + $0x1e8] ss:$16 sps:$4 sm:$0xff]   ;;  %v1983_v3 = vld [vmem:[#allocation5 + $0x204] ss:$16 sps:$4 sm:$0xff]  }
  0x3e   :  { %1279 = vmatprep.subr.bf16.mxu0 %v1921_v24  ;;  %1451 = vmatprep.subr.bf16.mxu1 %v1923_v25  ;;  %v44_v4 = vld [vmem:[#allocation2] sm:$0xff]  ;;  %v1986_v6 = vld [vmem:[#allocation5 + $0x20c] ss:$16 sps:$4 sm:$0xff]   ;;  %v1984_v8 = vld [vmem:[#allocation5 + $0x208] ss:$16 sps:$4 sm:$0xff]   ;;  %s1632_s14 = sshll.u32 %s2258_s13, 4  ;;  %s1633_s14 = int_to_ptr.vmem [resolvable:$true] %s1632_s14 }
  0x3f   :  { %v1981_v7 = vld [vmem:[#allocation5 + $0x200] ss:$16 sps:$4 sm:$0xff]   ;;  %v58_v9 = vpack.c.bf16 %v51_v5, %v44_v4  ;;  %v1989_v10 = vld [vmem:[#allocation5 + $0x224] ss:$16 sps:$4 sm:$0xff]   ;;  %v1992_v11 = vld [vmem:[#allocation5 + $0x22c] ss:$16 sps:$4 sm:$0xff]   ;;  %p2228_p3 = scmp.lt.s32.totalorder %s1633_s14, %s1633_s14 }
  0x40   :  { %v1987_v12 = vld [vmem:[#allocation5 + $0x220] ss:$16 sps:$4 sm:$0xff]   ;;  %v1990_v13 = vld [vmem:[#allocation5 + $0x228] ss:$16 sps:$4 sm:$0xff]   ;;  %v1995_v14 = vld [vmem:[#allocation5 + $0x244] ss:$16 sps:$4 sm:$0xff]  }
  0x41   :  { %1280 = vmatpush1.bf16.msra.mxu0 %v1925_v26  ;;  %1452 = vmatpush1.bf16.msra.mxu1 %v1926_v27  ;;  %v1998_v15 = vld [vmem:[#allocation5 + $0x24c] ss:$16 sps:$4 sm:$0xff]   ;;  %v1993_v16 = vld [vmem:[#allocation5 + $0x240] ss:$16 sps:$4 sm:$0xff]   ;;  %v1996_v17 = vld [vmem:[#allocation5 + $0x248] ss:$16 sps:$4 sm:$0xff]  }
  0x42   :  { %1281 = vmatprep.subr.bf16.mxu0 %v1927_v28  ;;  %1453 = vmatprep.subr.bf16.mxu1 %v1929_v29  ;;  %v2001_v18 = vld [vmem:[#allocation5 + $0x264] ss:$16 sps:$4 sm:$0xff]   ;;  %v2004_v19 = vld [vmem:[#allocation5 + $0x26c] ss:$16 sps:$4 sm:$0xff]   ;;  %v1999_v20 = vld [vmem:[#allocation5 + $0x260] ss:$16 sps:$4 sm:$0xff]  }
  0x43   :  { %v2002_v21 = vld [vmem:[#allocation5 + $0x268] ss:$16 sps:$4 sm:$0xff]   ;;  %v2007_v22 = vld [vmem:[#allocation5 + $0x284] ss:$16 sps:$4 sm:$0xff]   ;;  %v2010_v23 = vld [vmem:[#allocation5 + $0x28c] ss:$16 sps:$4 sm:$0xff]  }
  0x44   :  { %v2005_v24 = vld [vmem:[#allocation5 + $0x280] ss:$16 sps:$4 sm:$0xff]   ;;  %v2008_v25 = vld [vmem:[#allocation5 + $0x288] ss:$16 sps:$4 sm:$0xff]   ;;  %v2013_v26 = vld [vmem:[#allocation5 + $0x2a4] ss:$16 sps:$4 sm:$0xff]  }
  0x45   :  { %1282 = vmatpush1.bf16.msra.mxu0 %v1931_v30  ;;  %1454 = vmatpush1.bf16.msra.mxu1 %v1932_v31  ;;  %v2016_v27 = vld [vmem:[#allocation5 + $0x2ac] ss:$16 sps:$4 sm:$0xff]   ;;  %v2011_v28 = vld [vmem:[#allocation5 + $0x2a0] ss:$16 sps:$4 sm:$0xff]   ;;  %v2014_v29 = vld [vmem:[#allocation5 + $0x2a8] ss:$16 sps:$4 sm:$0xff]  }
  0x46   :  { %1283 = vmatprep.subr.bf16.mxu0 %v1933_v32  ;;  %1455 = vmatprep.subr.bf16.mxu1 %v1935_v33  ;;  %v2019_v30 = vld [vmem:[#allocation5 + $0x2c4] ss:$16 sps:$4 sm:$0xff]   ;;  %v2022_v31 = vld [vmem:[#allocation5 + $0x2cc] ss:$16 sps:$4 sm:$0xff]   ;;  %v2035_v47 = vld [vmem:[#allocation5 + $0x320] ss:$16 sps:$4 sm:$0xff]  }
  0x47   :  { %v47_v32 = vld [vmem:[#allocation2 + $0x18] sm:$0xff]  ;;  %v54_v33 = vld [vmem:[#allocation2 + $0x50] sm:$0xff] }
  0x48   :  { %v2040_v46 = vld [vmem:[#allocation5 + $0x32c] ss:$16 sps:$4 sm:$0xff]   ;;  %v2068_v4 = vld [vmem:[#allocation5 + $0x3c8] ss:$16 sps:$4 sm:$0xff]   ;;  %v2073_v5 = vld [vmem:[#allocation5 + $0x3e4] ss:$16 sps:$4 sm:$0xff]  }
  0x49   :  { %1284 = vmatpush1.bf16.msra.mxu0 %v1937_v34  ;;  %1456 = vmatpush1.bf16.msra.mxu1 %v1938_v35  ;;  %v2017_v34 = vld [vmem:[#allocation5 + $0x2c0] ss:$16 sps:$4 sm:$0xff]   ;;  %v2020_v35 = vld [vmem:[#allocation5 + $0x2c8] ss:$16 sps:$4 sm:$0xff]   ;;  %v2046_v50 = vld [vmem:[#allocation5 + $0x34c] ss:$16 sps:$4 sm:$0xff]  }
  0x4a   :  { %1285 = vmatprep.subr.bf16.mxu0 %v1939_v36  ;;  %1457 = vmatprep.subr.bf16.mxu1 %v1941_v37  ;;  %v61_v36 = vpack.c.bf16 %v54_v33, %v47_v32  ;;  %v2025_v37 = vld [vmem:[#allocation5 + $0x2e4] ss:$16 sps:$4 sm:$0xff]   ;;  %v2106_v32 = vld [vmem:[#allocation5 + $0x48c] ss:$16 sps:$4 sm:$0xff]   ;;  %v2101_v33 = vld [vmem:[#allocation5 + $0x480] ss:$16 sps:$4 sm:$0xff]  }
  0x4d   :  { %1286 = vmatpush1.bf16.msra.mxu0 %v1943_v38  ;;  %1458 = vmatpush1.bf16.msra.mxu1 %v1944_v39  ;;  %v2028_v38 = vld [vmem:[#allocation5 + $0x2ec] ss:$16 sps:$4 sm:$0xff]   ;;  %v2023_v39 = vld [vmem:[#allocation5 + $0x2e0] ss:$16 sps:$4 sm:$0xff]  }
  0x4e   :  { %1287 = vmatprep.subr.bf16.mxu0 %v1945_v40  ;;  %1459 = vmatprep.subr.bf16.mxu1 %v1947_v41  ;;  %v2026_v40 = vld [vmem:[#allocation5 + $0x2e8] ss:$16 sps:$4 sm:$0xff]   ;;  %v2031_v41 = vld [vmem:[#allocation5 + $0x304] ss:$16 sps:$4 sm:$0xff]  }
  0x51   :  { %1288 = vmatpush1.bf16.msra.mxu0 %v1949_v42  ;;  %1460 = vmatpush1.bf16.msra.mxu1 %v1950_v43  ;;  %v2034_v42 = vld [vmem:[#allocation5 + $0x30c] ss:$16 sps:$4 sm:$0xff]   ;;  %v2029_v43 = vld [vmem:[#allocation5 + $0x300] ss:$16 sps:$4 sm:$0xff]  }
  0x52   :  { %1289 = vmatprep.subr.bf16.mxu0 %v1951_v44  ;;  %1461 = vmatprep.subr.bf16.mxu1 %v1953_v45  ;;  %v2032_v44 = vld [vmem:[#allocation5 + $0x308] ss:$16 sps:$4 sm:$0xff]   ;;  %v2037_v45 = vld [vmem:[#allocation5 + $0x324] ss:$16 sps:$4 sm:$0xff]  }
  0x55   :  { %1290 = vmatpush1.bf16.msra.mxu0 %v1955_v48  ;;  %1462 = vmatpush1.bf16.msra.mxu1 %v1956_v49  ;;  %v2038_v48 = vld [vmem:[#allocation5 + $0x328] ss:$16 sps:$4 sm:$0xff]   ;;  %v2043_v49 = vld [vmem:[#allocation5 + $0x344] ss:$16 sps:$4 sm:$0xff]  }
  0x56   :  { %1291 = vmatprep.subr.bf16.mxu0 %v1957_v51  ;;  %1463 = vmatprep.subr.bf16.mxu1 %v1959_v52  ;;  %v2041_v51 = vld [vmem:[#allocation5 + $0x340] ss:$16 sps:$4 sm:$0xff]   ;;  %v2044_v52 = vld [vmem:[#allocation5 + $0x348] ss:$16 sps:$4 sm:$0xff]  }
  0x59   :  { %1292 = vmatpush1.bf16.msra.mxu0 %v1961_v53  ;;  %1464 = vmatpush1.bf16.msra.mxu1 %v1962_v54  ;;  %v2049_v53 = vld [vmem:[#allocation5 + $0x364] ss:$16 sps:$4 sm:$0xff]   ;;  %v2052_v54 = vld [vmem:[#allocation5 + $0x36c] ss:$16 sps:$4 sm:$0xff]  }
  0x5a   :  { %1293 = vmatprep.subr.bf16.mxu0 %v1963_v55  ;;  %1465 = vmatprep.subr.bf16.mxu1 %v1965_v56  ;;  %v2047_v55 = vld [vmem:[#allocation5 + $0x360] ss:$16 sps:$4 sm:$0xff]   ;;  %v2050_v56 = vld [vmem:[#allocation5 + $0x368] ss:$16 sps:$4 sm:$0xff]  }
  0x5d   :  { %1294 = vmatpush1.bf16.msra.mxu0 %v1967_v57  ;;  %1466 = vmatpush1.bf16.msra.mxu1 %v1968_v58  ;;  %v2055_v57 = vld [vmem:[#allocation5 + $0x384] ss:$16 sps:$4 sm:$0xff]   ;;  %v2058_v58 = vld [vmem:[#allocation5 + $0x38c] ss:$16 sps:$4 sm:$0xff]  }
  0x5e   :  { %1295 = vmatprep.subr.bf16.mxu0 %v1969_v59  ;;  %1467 = vmatprep.subr.bf16.mxu1 %v1971_v60  ;;  %v2053_v59 = vld [vmem:[#allocation5 + $0x380] ss:$16 sps:$4 sm:$0xff]   ;;  %v2056_v60 = vld [vmem:[#allocation5 + $0x388] ss:$16 sps:$4 sm:$0xff]  }
  0x61   :  { %1296 = vmatpush1.bf16.msra.mxu0 %v1973_v61  ;;  %1468 = vmatpush1.bf16.msra.mxu1 %v1974_v62  ;;  %v2061_v61 = vld [vmem:[#allocation5 + $0x3a4] ss:$16 sps:$4 sm:$0xff]   ;;  %v2064_v62 = vld [vmem:[#allocation5 + $0x3ac] ss:$16 sps:$4 sm:$0xff]  }
  0x62   :  { %1297 = vmatprep.subr.bf16.mxu0 %v1975_v63  ;;  %1469 = vmatprep.subr.bf16.mxu1 %v1977_v0  ;;  %v2059_v63 = vld [vmem:[#allocation5 + $0x3a0] ss:$16 sps:$4 sm:$0xff]   ;;  %v2062_v0 = vld [vmem:[#allocation5 + $0x3a8] ss:$16 sps:$4 sm:$0xff]  }
  0x65   :  { %1298 = vmatpush1.bf16.msra.mxu0 %v1979_v1  ;;  %1470 = vmatpush1.bf16.msra.mxu1 %v1980_v2  ;;  %v2067_v1 = vld [vmem:[#allocation5 + $0x3c4] ss:$16 sps:$4 sm:$0xff]   ;;  %v2070_v2 = vld [vmem:[#allocation5 + $0x3cc] ss:$16 sps:$4 sm:$0xff]  }
  0x66   :  { %1310 = vmatprep.subr.bf16.mxu0 %v1983_v3  ;;  %1482 = vmatprep.subr.bf16.mxu1 %v1986_v6  ;;  %v2065_v3 = vld [vmem:[#allocation5 + $0x3c0] ss:$16 sps:$4 sm:$0xff]   ;;  %v2076_v6 = vld [vmem:[#allocation5 + $0x3ec] ss:$16 sps:$4 sm:$0xff]  }
  0x68   :  { %1300 = vmatmul.mubr.bf16.vlgmr.msra.gmra.mrb[0].mxu0 %v58_v9  ;;  %1472 = vmatmul.mubr.bf16.vlgmr.msra.gmra.mrb[0].mxu1 %v58_v9  ;;  %v2079_v9 = vld [vmem:[#allocation5 + $0x404] ss:$16 sps:$4 sm:$0xff]  }
  0x69   :  { %1311 = vmatpush1.bf16.msra.mxu0 %v1981_v7  ;;  %1483 = vmatpush1.bf16.msra.mxu1 %v1984_v8  ;;  %v2071_v7 = vld [vmem:[#allocation5 + $0x3e0] ss:$16 sps:$4 sm:$0xff]   ;;  %v2074_v8 = vld [vmem:[#allocation5 + $0x3e8] ss:$16 sps:$4 sm:$0xff]  }
  0x6a   :  { %1312 = vmatprep.subr.bf16.mxu0 %v1989_v10  ;;  %1484 = vmatprep.subr.bf16.mxu1 %v1992_v11  ;;  %v46_v10 = vld [vmem:[#allocation2 + $0x10] sm:$0xff]  ;;  %v53_v11 = vld [vmem:[#allocation2 + $0x48] sm:$0xff] }
  0x6b   :  { %1342 = vmatprep.mubr.bf16.mxu0 %v61_v36  ;;  %1514 = vmatprep.mubr.bf16.mxu1 %v61_v36  ;;  %v2112_v36 = vld [vmem:[#allocation5 + $0x4ac] ss:$16 sps:$4 sm:$0xff]  }
  0x6d   :  { %1313 = vmatpush1.bf16.msra.mxu0 %v1987_v12  ;;  %1485 = vmatpush1.bf16.msra.mxu1 %v1990_v13  ;;  %v2082_v12 = vld [vmem:[#allocation5 + $0x40c] ss:$16 sps:$4 sm:$0xff]   ;;  %v2077_v13 = vld [vmem:[#allocation5 + $0x400] ss:$16 sps:$4 sm:$0xff]  }
  0x6e   :  { %1314 = vmatprep.subr.bf16.mxu0 %v1995_v14  ;;  %1486 = vmatprep.subr.bf16.mxu1 %v1998_v15  ;;  %v2080_v14 = vld [vmem:[#allocation5 + $0x408] ss:$16 sps:$4 sm:$0xff]   ;;  %v60_v15 = vpack.c.bf16 %v53_v11, %v46_v10  ;;  %v2169_v11 = vld [vmem:[#allocation5 + $0x5e4] ss:$16 sps:$4 sm:$0xff]  }
  0x6f   :  { %v2164_v10 = vld [vmem:[#allocation5 + $0x5c8] ss:$16 sps:$4 sm:$0xff]  }
  0x71   :  { %1315 = vmatpush1.bf16.msra.mxu0 %v1993_v16  ;;  %1487 = vmatpush1.bf16.msra.mxu1 %v1996_v17  ;;  %v2085_v16 = vld [vmem:[#allocation5 + $0x424] ss:$16 sps:$4 sm:$0xff]   ;;  %v2088_v17 = vld [vmem:[#allocation5 + $0x42c] ss:$16 sps:$4 sm:$0xff]  }
  0x72   :  { %1316 = vmatprep.subr.bf16.mxu0 %v2001_v18  ;;  %1488 = vmatprep.subr.bf16.mxu1 %v2004_v19  ;;  %v49_v18 = vld [vmem:[#allocation2 + $0x28] sm:$0xff]  ;;  %v2083_v19 = vld [vmem:[#allocation5 + $0x420] ss:$16 sps:$4 sm:$0xff]  }
  0x75   :  { %1317 = vmatpush1.bf16.msra.mxu0 %v1999_v20  ;;  %1489 = vmatpush1.bf16.msra.mxu1 %v2002_v21  ;;  %v2086_v20 = vld [vmem:[#allocation5 + $0x428] ss:$16 sps:$4 sm:$0xff]   ;;  %v56_v21 = vld [vmem:[#allocation2 + $0x60] sm:$0xff] }
  0x76   :  { %1318 = vmatprep.subr.bf16.mxu0 %v2007_v22  ;;  %1490 = vmatprep.subr.bf16.mxu1 %v2010_v23  ;;  %v2091_v22 = vld [vmem:[#allocation5 + $0x444] ss:$16 sps:$4 sm:$0xff]   ;;  %v63_v23 = vpack.c.bf16 %v56_v21, %v49_v18  ;;  %v2178_v18 = vld [vmem:[#allocation5 + $0x60c] ss:$16 sps:$4 sm:$0xff]   ;;  %v2176_v21 = vld [vmem:[#allocation5 + $0x608] ss:$16 sps:$4 sm:$0xff]  }
  0x79   :  { %1319 = vmatpush1.bf16.msra.mxu0 %v2005_v24  ;;  %1491 = vmatpush1.bf16.msra.mxu1 %v2008_v25  ;;  %v2094_v24 = vld [vmem:[#allocation5 + $0x44c] ss:$16 sps:$4 sm:$0xff]   ;;  %v2089_v25 = vld [vmem:[#allocation5 + $0x440] ss:$16 sps:$4 sm:$0xff]  }
  0x7a   :  { %1320 = vmatprep.subr.bf16.mxu0 %v2013_v26  ;;  %1492 = vmatprep.subr.bf16.mxu1 %v2016_v27  ;;  %v2092_v26 = vld [vmem:[#allocation5 + $0x448] ss:$16 sps:$4 sm:$0xff]   ;;  %v2097_v27 = vld [vmem:[#allocation5 + $0x464] ss:$16 sps:$4 sm:$0xff]  }
  0x7d   :  { %1321 = vmatpush1.bf16.msra.mxu0 %v2011_v28  ;;  %1493 = vmatpush1.bf16.msra.mxu1 %v2014_v29  ;;  %v2100_v28 = vld [vmem:[#allocation5 + $0x46c] ss:$16 sps:$4 sm:$0xff]   ;;  %v2095_v29 = vld [vmem:[#allocation5 + $0x460] ss:$16 sps:$4 sm:$0xff]  }
  0x7e   :  { %1322 = vmatprep.subr.bf16.mxu0 %v2019_v30  ;;  %1494 = vmatprep.subr.bf16.mxu1 %v2022_v31  ;;  %v2098_v30 = vld [vmem:[#allocation5 + $0x468] ss:$16 sps:$4 sm:$0xff]   ;;  %v2103_v31 = vld [vmem:[#allocation5 + $0x484] ss:$16 sps:$4 sm:$0xff]  }
  0x81   :  { %1323 = vmatpush1.bf16.msra.mxu0 %v2017_v34  ;;  %1495 = vmatpush1.bf16.msra.mxu1 %v2020_v35  ;;  %v2104_v34 = vld [vmem:[#allocation5 + $0x488] ss:$16 sps:$4 sm:$0xff]   ;;  %v2109_v35 = vld [vmem:[#allocation5 + $0x4a4] ss:$16 sps:$4 sm:$0xff]  }
  0x82   :  { %1324 = vmatprep.subr.bf16.mxu0 %v2025_v37  ;;  %1496 = vmatprep.subr.bf16.mxu1 %v2028_v38  ;;  %v2107_v37 = vld [vmem:[#allocation5 + $0x4a0] ss:$16 sps:$4 sm:$0xff]   ;;  %v2110_v38 = vld [vmem:[#allocation5 + $0x4a8] ss:$16 sps:$4 sm:$0xff]  }
  0x85   :  { %1325 = vmatpush1.bf16.msra.mxu0 %v2023_v39  ;;  %1497 = vmatpush1.bf16.msra.mxu1 %v2026_v40  ;;  %v2115_v39 = vld [vmem:[#allocation5 + $0x4c4] ss:$16 sps:$4 sm:$0xff]   ;;  %v2118_v40 = vld [vmem:[#allocation5 + $0x4cc] ss:$16 sps:$4 sm:$0xff]  }
  0x86   :  { %1326 = vmatprep.subr.bf16.mxu0 %v2031_v41  ;;  %1498 = vmatprep.subr.bf16.mxu1 %v2034_v42  ;;  %v2113_v41 = vld [vmem:[#allocation5 + $0x4c0] ss:$16 sps:$4 sm:$0xff]   ;;  %v2116_v42 = vld [vmem:[#allocation5 + $0x4c8] ss:$16 sps:$4 sm:$0xff]  }
  0x89   :  { %1327 = vmatpush1.bf16.msra.mxu0 %v2029_v43  ;;  %1499 = vmatpush1.bf16.msra.mxu1 %v2032_v44  ;;  %v2121_v43 = vld [vmem:[#allocation5 + $0x4e4] ss:$16 sps:$4 sm:$0xff]   ;;  %v2124_v44 = vld [vmem:[#allocation5 + $0x4ec] ss:$16 sps:$4 sm:$0xff]  }
  0x8a   :  { %1328 = vmatprep.subr.bf16.mxu0 %v2037_v45  ;;  %1500 = vmatprep.subr.bf16.mxu1 %v2040_v46  ;;  %v2119_v45 = vld [vmem:[#allocation5 + $0x4e0] ss:$16 sps:$4 sm:$0xff]   ;;  %v2122_v46 = vld [vmem:[#allocation5 + $0x4e8] ss:$16 sps:$4 sm:$0xff]  }
  0x8d   :  { %1329 = vmatpush1.bf16.msra.mxu0 %v2035_v47  ;;  %1501 = vmatpush1.bf16.msra.mxu1 %v2038_v48  ;;  %v2127_v47 = vld [vmem:[#allocation5 + $0x504] ss:$16 sps:$4 sm:$0xff]   ;;  %v2130_v48 = vld [vmem:[#allocation5 + $0x50c] ss:$16 sps:$4 sm:$0xff]  }
  0x8e   :  { %1330 = vmatprep.subr.bf16.mxu0 %v2043_v49  ;;  %1502 = vmatprep.subr.bf16.mxu1 %v2046_v50  ;;  %v2125_v49 = vld [vmem:[#allocation5 + $0x500] ss:$16 sps:$4 sm:$0xff]   ;;  %v2128_v50 = vld [vmem:[#allocation5 + $0x508] ss:$16 sps:$4 sm:$0xff]  }
  0x91   :  { %1331 = vmatpush1.bf16.msra.mxu0 %v2041_v51  ;;  %1503 = vmatpush1.bf16.msra.mxu1 %v2044_v52  ;;  %v2133_v51 = vld [vmem:[#allocation5 + $0x524] ss:$16 sps:$4 sm:$0xff]   ;;  %v2136_v52 = vld [vmem:[#allocation5 + $0x52c] ss:$16 sps:$4 sm:$0xff]  }
  0x92   :  { %1332 = vmatprep.subr.bf16.mxu0 %v2049_v53  ;;  %1504 = vmatprep.subr.bf16.mxu1 %v2052_v54  ;;  %v2131_v53 = vld [vmem:[#allocation5 + $0x520] ss:$16 sps:$4 sm:$0xff]   ;;  %v2134_v54 = vld [vmem:[#allocation5 + $0x528] ss:$16 sps:$4 sm:$0xff]  }
  0x95   :  { %1333 = vmatpush1.bf16.msra.mxu0 %v2047_v55  ;;  %1505 = vmatpush1.bf16.msra.mxu1 %v2050_v56  ;;  %v2139_v55 = vld [vmem:[#allocation5 + $0x544] ss:$16 sps:$4 sm:$0xff]   ;;  %v2142_v56 = vld [vmem:[#allocation5 + $0x54c] ss:$16 sps:$4 sm:$0xff]  }
  0x96   :  { %1334 = vmatprep.subr.bf16.mxu0 %v2055_v57  ;;  %1506 = vmatprep.subr.bf16.mxu1 %v2058_v58  ;;  %v2137_v57 = vld [vmem:[#allocation5 + $0x540] ss:$16 sps:$4 sm:$0xff]   ;;  %v2140_v58 = vld [vmem:[#allocation5 + $0x548] ss:$16 sps:$4 sm:$0xff]  }
  0x99   :  { %1335 = vmatpush1.bf16.msra.mxu0 %v2053_v59  ;;  %1507 = vmatpush1.bf16.msra.mxu1 %v2056_v60  ;;  %v2145_v59 = vld [vmem:[#allocation5 + $0x564] ss:$16 sps:$4 sm:$0xff]   ;;  %v2148_v60 = vld [vmem:[#allocation5 + $0x56c] ss:$16 sps:$4 sm:$0xff]  }
  0x9a   :  { %1336 = vmatprep.subr.bf16.mxu0 %v2061_v61  ;;  %1508 = vmatprep.subr.bf16.mxu1 %v2064_v62  ;;  %v2143_v61 = vld [vmem:[#allocation5 + $0x560] ss:$16 sps:$4 sm:$0xff]   ;;  %v2146_v62 = vld [vmem:[#allocation5 + $0x568] ss:$16 sps:$4 sm:$0xff]  }
  0x9d   :  { %1337 = vmatpush1.bf16.msra.mxu0 %v2059_v63  ;;  %1509 = vmatpush1.bf16.msra.mxu1 %v2062_v0  ;;  %v2151_v63 = vld [vmem:[#allocation5 + $0x584] ss:$16 sps:$4 sm:$0xff]   ;;  %v2154_v0 = vld [vmem:[#allocation5 + $0x58c] ss:$16 sps:$4 sm:$0xff]  }
  0x9e   :  { %1338 = vmatprep.subr.bf16.mxu0 %v2067_v1  ;;  %1510 = vmatprep.subr.bf16.mxu1 %v2070_v2  ;;  %v2149_v1 = vld [vmem:[#allocation5 + $0x580] ss:$16 sps:$4 sm:$0xff]   ;;  %v2152_v2 = vld [vmem:[#allocation5 + $0x588] ss:$16 sps:$4 sm:$0xff]  }
  0xa1   :  { %1339 = vmatpush1.bf16.msra.mxu0 %v2065_v3  ;;  %1511 = vmatpush1.bf16.msra.mxu1 %v2068_v4  ;;  %v2157_v3 = vld [vmem:[#allocation5 + $0x5a4] ss:$16 sps:$4 sm:$0xff]   ;;  %v2160_v4 = vld [vmem:[#allocation5 + $0x5ac] ss:$16 sps:$4 sm:$0xff]  }
  0xa2   :  { %1340 = vmatprep.subr.bf16.mxu0 %v2073_v5  ;;  %1512 = vmatprep.subr.bf16.mxu1 %v2076_v6  ;;  %v2155_v5 = vld [vmem:[#allocation5 + $0x5a0] ss:$16 sps:$4 sm:$0xff]   ;;  %v2158_v6 = vld [vmem:[#allocation5 + $0x5a8] ss:$16 sps:$4 sm:$0xff]  }
  0xa5   :  { %1341 = vmatpush1.bf16.msra.mxu0 %v2071_v7  ;;  %1513 = vmatpush1.bf16.msra.mxu1 %v2074_v8  ;;  %v2163_v7 = vld [vmem:[#allocation5 + $0x5c4] ss:$16 sps:$4 sm:$0xff]   ;;  %v2166_v8 = vld [vmem:[#allocation5 + $0x5cc] ss:$16 sps:$4 sm:$0xff]  }
  0xa6   :  { %1353 = vmatprep.subr.bf16.mxu0 %v2079_v9  ;;  %1525 = vmatprep.subr.bf16.mxu1 %v2082_v12  ;;  %v2161_v9 = vld [vmem:[#allocation5 + $0x5c0] ss:$16 sps:$4 sm:$0xff]   ;;  %v2172_v12 = vld [vmem:[#allocation5 + $0x5ec] ss:$16 sps:$4 sm:$0xff]  }
  0xa8   :  { %1343 = vmatmul.mubr.bf16.vlgmr.msra.gmra.mrb[0].mxu0 %v60_v15  ;;  %1515 = vmatmul.mubr.bf16.vlgmr.msra.gmra.mrb[0].mxu1 %v60_v15  ;;  %v48_v15 = vld [vmem:[#allocation2 + $0x20] sm:$0xff] }
  0xa9   :  { %1354 = vmatpush1.bf16.msra.mxu0 %v2077_v13  ;;  %1526 = vmatpush1.bf16.msra.mxu1 %v2080_v14  ;;  %v2167_v13 = vld [vmem:[#allocation5 + $0x5e0] ss:$16 sps:$4 sm:$0xff]   ;;  %v2170_v14 = vld [vmem:[#allocation5 + $0x5e8] ss:$16 sps:$4 sm:$0xff]  }
  0xaa   :  { %1355 = vmatprep.subr.bf16.mxu0 %v2085_v16  ;;  %1527 = vmatprep.subr.bf16.mxu1 %v2088_v17  ;;  %v55_v16 = vld [vmem:[#allocation2 + $0x58] sm:$0xff]  ;;  %v2175_v17 = vld [vmem:[#allocation5 + $0x604] ss:$16 sps:$4 sm:$0xff]  }
  0xab   :  { %1385 = vmatprep.mubr.bf16.mxu0 %v63_v23  ;;  %1557 = vmatprep.mubr.bf16.mxu1 %v63_v23  ;;  %v50_v23 = vld [vmem:[#allocation2 + $0x30] sm:$0xff] }
  0xad   :  { %1356 = vmatpush1.bf16.msra.mxu0 %v2083_v19  ;;  %1528 = vmatpush1.bf16.msra.mxu1 %v2086_v20  ;;  %v62_v19 = vpack.c.bf16 %v55_v16, %v48_v15  ;;  %v2173_v20 = vld [vmem:[#allocation5 + $0x600] ss:$16 sps:$4 sm:$0xff]  }
  0xae   :  { %1357 = vmatprep.subr.bf16.mxu0 %v2091_v22  ;;  %1529 = vmatprep.subr.bf16.mxu1 %v2094_v24  ;;  %v2257_v22 = vmov 0   ;;  %v57_v24 = vld [vmem:[#allocation2 + $0x68] sm:$0xff] }
  0xb1   :  { %1358 = vmatpush1.bf16.msra.mxu0 %v2089_v25  ;;  %1530 = vmatpush1.bf16.msra.mxu1 %v2092_v26  ;;  %v64_v25 = vpack.c.bf16 %v57_v24, %v50_v23  ;;  %v263_v26 = vlaneseq }
  0xb2   :  { %1359 = vmatprep.subr.bf16.mxu0 %v2097_v27  ;;  %1531 = vmatprep.subr.bf16.mxu1 %v2100_v28 }
  0xb3   :  { %v264_v27 = vshrl.u32 %v263_v26, 7 }
  0xb5   :  { %1360 = vmatpush1.bf16.msra.mxu0 %v2095_v29  ;;  %1532 = vmatpush1.bf16.msra.mxu1 %v2098_v30  ;;  %v265_v28 = vsub.s32 0, %v264_v27  ;;  %v273_v29 = vsub.s32 2, %v264_v27  ;;  %v261_v30 = vld [vmem:[%s2322_s2] sm:$0xf]  ;;  %s2223_s2 = scalar_lea.vmem %s1633_s14, 1024 }
  0xb6   :  { %1361 = vmatprep.subr.bf16.mxu0 %v2103_v31  ;;  %1533 = vmatprep.subr.bf16.mxu1 %v2106_v32  ;;  %v269_v31 = vsub.s32 1, %v264_v27  ;;  %v277_v32 = vsub.s32 3, %v264_v27  ;;  %p2224_p2 = scmp.ne.s32.totalorder %s1633_s14, %s2223_s2  ;;  %p2229_p4 = scmp.lt.s32.totalorder %s2223_s2, %s2223_s2 }
  0xb8   :  { %p2230_p5 = por %p2229_p4, %p2228_p3 }
  0xb9   :  { %1362 = vmatpush1.bf16.msra.mxu0 %v2101_v33  ;;  %1534 = vmatpush1.bf16.msra.mxu1 %v2104_v34  ;;  %v266_v33 = vrot.slane %v261_v30, %v265_v28  ;;  %v274_v34 = vrot.slane %v261_v30, %v273_v29 }
  0xba   :  { %1363 = vmatprep.subr.bf16.mxu0 %v2109_v35  ;;  %1535 = vmatprep.subr.bf16.mxu1 %v2112_v36  ;;  %v270_v35 = vrot.slane %v261_v30, %v269_v31  ;;  %v278_v36 = vrot.slane %v261_v30, %v277_v32  ;;  %p2231_p6 = pnand %p2230_p5, %p2224_p2 }
  0xbd   :  { %1364 = vmatpush1.bf16.msra.mxu0 %v2107_v37  ;;  %1536 = vmatpush1.bf16.msra.mxu1 %v2110_v38 }
  0xbe   :  { %1365 = vmatprep.subr.bf16.mxu0 %v2115_v39  ;;  %1537 = vmatprep.subr.bf16.mxu1 %v2118_v40 }
  0xc1   :  { %1366 = vmatpush1.bf16.msra.mxu0 %v2113_v41  ;;  %1538 = vmatpush1.bf16.msra.mxu1 %v2116_v42 }
  0xc2   :  { %1367 = vmatprep.subr.bf16.mxu0 %v2121_v43  ;;  %1539 = vmatprep.subr.bf16.mxu1 %v2124_v44 }
  0xc5   :  { %1368 = vmatpush1.bf16.msra.mxu0 %v2119_v45  ;;  %1540 = vmatpush1.bf16.msra.mxu1 %v2122_v46 }
  0xc6   :  { %1369 = vmatprep.subr.bf16.mxu0 %v2127_v47  ;;  %1541 = vmatprep.subr.bf16.mxu1 %v2130_v48 }
  0xc9   :  { %1370 = vmatpush1.bf16.msra.mxu0 %v2125_v49  ;;  %1542 = vmatpush1.bf16.msra.mxu1 %v2128_v50 }
  0xca   :  { %1371 = vmatprep.subr.bf16.mxu0 %v2133_v51  ;;  %1543 = vmatprep.subr.bf16.mxu1 %v2136_v52 }
  0xcd   :  { %1372 = vmatpush1.bf16.msra.mxu0 %v2131_v53  ;;  %1544 = vmatpush1.bf16.msra.mxu1 %v2134_v54 }
  0xce   :  { %1373 = vmatprep.subr.bf16.mxu0 %v2139_v55  ;;  %1545 = vmatprep.subr.bf16.mxu1 %v2142_v56 }
  0xd1   :  { %1374 = vmatpush1.bf16.msra.mxu0 %v2137_v57  ;;  %1546 = vmatpush1.bf16.msra.mxu1 %v2140_v58 }
  0xd2   :  { %1375 = vmatprep.subr.bf16.mxu0 %v2145_v59  ;;  %1547 = vmatprep.subr.bf16.mxu1 %v2148_v60 }
  0xd5   :  { %1376 = vmatpush1.bf16.msra.mxu0 %v2143_v61  ;;  %1548 = vmatpush1.bf16.msra.mxu1 %v2146_v62 }
  0xd6   :  { %1377 = vmatprep.subr.bf16.mxu0 %v2151_v63  ;;  %1549 = vmatprep.subr.bf16.mxu1 %v2154_v0 }
  0xd9   :  { %1378 = vmatpush1.bf16.msra.mxu0 %v2149_v1  ;;  %1550 = vmatpush1.bf16.msra.mxu1 %v2152_v2 }
  0xda   :  { %1379 = vmatprep.subr.bf16.mxu0 %v2157_v3  ;;  %1551 = vmatprep.subr.bf16.mxu1 %v2160_v4 }
  0xdd   :  { %1380 = vmatpush1.bf16.msra.mxu0 %v2155_v5  ;;  %1552 = vmatpush1.bf16.msra.mxu1 %v2158_v6 }
  0xde   :  { %1381 = vmatprep.subr.bf16.mxu0 %v2163_v7  ;;  %1553 = vmatprep.subr.bf16.mxu1 %v2166_v8 }
  0xe1   :  { %1382 = vmatpush1.bf16.msra.mxu0 %v2161_v9  ;;  %1554 = vmatpush1.bf16.msra.mxu1 %v2164_v10 }
  0xe2   :  { %1383 = vmatprep.subr.bf16.mxu0 %v2169_v11  ;;  %1555 = vmatprep.subr.bf16.mxu1 %v2172_v12 }
  0xe5   :  { %1384 = vmatpush1.bf16.msra.mxu0 %v2167_v13  ;;  %1556 = vmatpush1.bf16.msra.mxu1 %v2170_v14 }
  0xe6   :  { %1396 = vmatprep.subr.bf16.mxu0 %v2175_v17  ;;  %1568 = vmatprep.subr.bf16.mxu1 %v2178_v18 }
  0xe8   :  { %1386 = vmatmul.mubr.bf16.vlgmr.msra.gmra.mrb[0].mxu0 %v62_v19  ;;  %1558 = vmatmul.mubr.bf16.vlgmr.msra.gmra.mrb[0].mxu1 %v62_v19 }
  0xe9   :  { %1397 = vmatpush1.bf16.msra.mxu0 %v2173_v20  ;;  %1569 = vmatpush1.bf16.msra.mxu1 %v2176_v21 }
  0xea   :  { %1428 = vmatprep.mubr.bf16.mxu0 %v2257_v22  ;;  %1600 = vmatprep.mubr.bf16.mxu1 %v2257_v22 }
  0xf4   :  { %1841 = vmatmul.mubr.msk.bf16.vlgmr.msra.gmra.mrb[0].mxu0 %vm1263_vm0, %v64_v25  ;;  %1842 = vmatmul.mubr.msk.bf16.vlgmr.msra.gmra.mrb[0].mxu1 %vm1263_vm0, %v64_v25 }
 0x1c7   :  { %v1430_v37 = vpop.f32.mrb[0].mxu0  ;;  %v1602_v38 = vpop.f32.mrb[0].mxu1 }
 0x1c8   :  { %v1843_v39 = vadd.f32 %v1430_v37, %v266_v33  ;;  %v1847_v40 = vadd.f32 %v1602_v38, %v274_v34  ;;  %v1432_v41 = vpop.f32.mrb[1].mxu0  ;;  %v1604_v42 = vpop.f32.mrb[1].mxu1 }
 0x1c9   :  { %v1844_v43 = vadd.f32 %v1432_v41, %v270_v35  ;;  %v1848_v44 = vadd.f32 %v1604_v42, %v278_v36  ;;  %v1434_v45 = vpop.f32.mrb[2].mxu0  ;;  %v1606_v46 = vpop.f32.mrb[2].mxu1 }
 0x1ca   :  { %v1611_v47 = vmax.f32 %v1843_v39, 0.0  ;;  %v1613_v48 = vmax.f32 %v1847_v40, 0.0  ;;  %v1845_v49 = vadd.f32 %v1434_v45, %v266_v33  ;;  %v1849_v50 = vadd.f32 %v1606_v46, %v274_v34  ;;  %v1436_v51 = vpop.f32.mrb[3].mxu0  ;;  %v1608_v52 = vpop.f32.mrb[3].mxu1 }
 0x1cb   :  { %v1612_v53 = vmax.f32 %v1844_v43, 0.0  ;;  %v1614_v54 = vmax.f32 %v1848_v44, 0.0  ;;  %v1846_v55 = vadd.f32 %v1436_v51, %v270_v35  ;;  %v1850_v56 = vadd.f32 %v1608_v52, %v278_v36 }
 0x1cc   :  { %1619 = vst [vmem:[#allocation7] sm:$0xff] %v1611_v47  ;;  %1621 = vst [vmem:[#allocation7 + $0x10] sm:$0xff] %v1613_v48  ;;  %v1615_v57 = vmax.f32 %v1845_v49, 0.0  ;;  %v1617_v58 = vmax.f32 %v1849_v50, 0.0 }
 0x1cd   :  { %1620 = vst [vmem:[#allocation7 + $0x8] sm:$0xff] %v1612_v53  ;;  %1622 = vst [vmem:[#allocation7 + $0x18] sm:$0xff] %v1614_v54  ;;  %v1616_v59 = vmax.f32 %v1846_v55, 0.0  ;;  %v1618_v60 = vmax.f32 %v1850_v56, 0.0 }
 0x1ce   :  { %1623 = vst [vmem:[#allocation7 + $0x20] sm:$0xff] %v1615_v57  ;;  %1625 = vst [vmem:[#allocation7 + $0x30] sm:$0xff] %v1617_v58 }
 0x1cf   :  { %1624 = vst [vmem:[#allocation7 + $0x28] sm:$0xff] %v1616_v59  ;;  %1626 = vst [vmem:[#allocation7 + $0x38] sm:$0xff] %v1618_v60 }
 0x1d0   :  { %2234 = shalt.err (!%p2231_p6)
}
 0x1d1   :  { %s2235_s17 = scalar_lea.hbm %s2323_s3, 1024 }
 0x1d2   :  { %p2236_p7 = scmp.ne.s32.totalorder %s2323_s3, %s2235_s17  ;;  %p2239_p8 = scmp.lt.u32.totalorder %s2235_s17, %s2323_s3 }
 0x1d4   :  { %p2241_p9 = pnand %p2239_p8, %p2236_p7 }
 0x1d6   :  { %2244 = shalt.err (!%p2241_p9)
}
 0x1d7   :  { %s2259_s22 = smov 512   ;;  %s2260_s23 = smov 32  }
 0x1d8   :  { %1638 = dma.vmem_to_hbm [thread:$0]  %s1633_s14, 1024, %s2323_s3, [#allocation4], %s2259_s22, %s2259_s22, %s2260_s23  }
 0x1d9   :  { %2249 = dma.done.wait [#allocation4], 1024  }
 0x1da   :  { %2250 = vsyncadd [#allocation4], 4294966272 }
 0x1db   :  { %1642 = vsyncpa [#allocation3], 1 }
 0x1dc   :  { %1643 = vsyncpa [#allocation6], 1 }
 0x1dd   :  { %1644 = vsyncpa [#allocation4], 1 }

</bundles_post_ra>
